<compile_context>
chip_gen: v5e
topology: v5e:2x2
jax: 0.10.0
libtpu: 0.0.40
codegen_flags: <defaults>
</compile_context>

<pallas_src>
import jax
import jax.numpy as jnp
from jax.experimental import pallas as pl
from jax.experimental.pallas import tpu as pltpu

FC_LAYER_SIZE = 32      # config.fc_layer_size
IN_DIM = 4              # CartPole state dim
OUT_DIM = 2             # number of actions

LANE = 128              # batch is the lane axis -> tiles are multiples of 128
MAX_TILE_B = 4096       # cap per-tile rows (keeps per-step VMEM tiny everywhere)
MIN_SPLIT_B = 1024      # below this, one tile; above, >=2 tiles (v7x megacore)


def _round_up(n, m):
    return ((n + m - 1) // m) * m


def _cdiv(a, b):
    return -(-a // b)


def _choose_tiling(batch):
    """Returns (padded_batch, tile_b); padded_batch % tile_b == 0, both % 128 == 0."""
    padded = _round_up(max(batch, 1), LANE)
    if padded < MIN_SPLIT_B:
        # small batch: single grid step (v5e/v6e are single-TC; fewer steps win)
        return padded, padded
    # large batch: at least 2 tiles so dimension_semantics=("parallel",) can
    # shard across v7x's 2 TensorCores; tiles capped at MAX_TILE_B.
    n_tiles = max(2, _cdiv(padded, MAX_TILE_B))
    tile = _round_up(_cdiv(padded, n_tiles), LANE)
    return tile * n_tiles, tile


def policy_kernel(x_ref, w1_ref, b1_ref, dw_ref, db_ref, o_ref):
    # x_ref : (IN_DIM, tb)       batch tile of states, batch on the lane axis
    # w1_ref: (H, IN_DIM)        fc1 weight (torch layout), VMEM-resident
    # b1_ref: (H, 1)             fc1 bias column
    # dw_ref: (H, 1)             w2[0, :] - w2[1, :]   (fc2 logit-difference weights)
    # db_ref: (1, 1) in SMEM     b2[0] - b2[1]
    # o_ref : (OUT_DIM, tb)      row 0 = P(action 0), row 1 = P(action 1)
    x = x_ref[...]
    w1 = w1_ref[...]

    # fc1 on the VPU: K=4 contraction as 4 broadcast multiply-adds.  The (H,1)
    # weight-column broadcast is tiny/batch-invariant; the (1,tb) state-row
    # broadcast is a cheap sublane broadcast; all 128 lanes carry batch rows.
    acc = w1[:, 0:1] * x[0:1, :]
    for k in range(1, IN_DIM):
        acc = acc + w1[:, k:k + 1] * x[k:k + 1, :]
    h = jnp.maximum(acc + b1_ref[...], 0.0)                      # (H, tb)

    # fc2 + 2-way softmax folded into the exact identity
    #   softmax([l0, l1]) = [sigmoid(l0 - l1), 1 - sigmoid(l0 - l1)]
    # -> one sublane reduction, one exp per state, exact division.
    d = jnp.sum(dw_ref[...] * h, axis=0, keepdims=True) + db_ref[0, 0]   # (1, tb)
    p0 = 1.0 / (1.0 + jnp.exp(-d))
    o_ref[0:1, :] = p0
    o_ref[1:2, :] = 1.0 - p0


def init_params(key):
    """Deterministic init mirroring torch.nn.Linear default (uniform +-1/sqrt(fan_in))."""
    k1, k2, k3, k4 = jax.random.split(key, 4)
    lim1 = 1.0 / jnp.sqrt(jnp.float32(IN_DIM))
    lim2 = 1.0 / jnp.sqrt(jnp.float32(FC_LAYER_SIZE))
    w1 = jax.random.uniform(k1, (FC_LAYER_SIZE, IN_DIM), jnp.float32, -lim1, lim1)
    b1 = jax.random.uniform(k2, (FC_LAYER_SIZE,), jnp.float32, -lim1, lim1)
    w2 = jax.random.uniform(k3, (OUT_DIM, FC_LAYER_SIZE), jnp.float32, -lim2, lim2)
    b2 = jax.random.uniform(k4, (OUT_DIM,), jnp.float32, -lim2, lim2)
    return w1, b1, w2, b2


def prepare_params(w1, b1, w2, b2):
    """One-time reshape / difference of fc2 params (outside the hot path)."""
    w1_k = w1.astype(jnp.float32)                                        # (H, 4)
    b1_k = b1.astype(jnp.float32).reshape(FC_LAYER_SIZE, 1)              # (H, 1)
    dw_k = (w2[0] - w2[1]).astype(jnp.float32).reshape(FC_LAYER_SIZE, 1)  # (H, 1)
    db_k = (b2[0] - b2[1]).astype(jnp.float32).reshape(1, 1)             # (1, 1)
    return w1_k, b1_k, dw_k, db_k


@jax.jit
def policy_forward_batch(x, w1_k, b1_k, dw_k, db_k):
    """x: (B, 4) float32 -> probs: (B, 2) float32 (per-state softmax over actions)."""
    batch = x.shape[0]
    padded, tile_b = _choose_tiling(batch)

    # one-time wrapper transpose so batch lands on the 128-lane axis
    xt = x.astype(jnp.float32).T                                 # (4, B)
    if padded != batch:
        xt = jnp.pad(xt, ((0, 0), (0, padded - batch)))

    grid = (padded // tile_b,)
    out = pl.pallas_call(
        policy_kernel,
        out_shape=jax.ShapeDtypeStruct((OUT_DIM, padded), jnp.float32),
        grid=grid,
        in_specs=[
            pl.BlockSpec((IN_DIM, tile_b), lambda i: (0, i)),            # batch tile varies
            pl.BlockSpec((FC_LAYER_SIZE, IN_DIM), lambda i: (0, 0)),     # weights resident
            pl.BlockSpec((FC_LAYER_SIZE, 1), lambda i: (0, 0)),          # in VMEM across
            pl.BlockSpec((FC_LAYER_SIZE, 1), lambda i: (0, 0)),          # the whole grid
            pl.BlockSpec(memory_space=pltpu.MemorySpace.SMEM),           # scalar bias diff
        ],
        out_specs=pl.BlockSpec((OUT_DIM, tile_b), lambda i: (0, i)),     # lane-dense (2, B)
        compiler_params=pltpu.CompilerParams(
            dimension_semantics=("parallel",)),   # v7x: shard batch across the 2 TCs
    )(xt, w1_k, b1_k, dw_k, db_k)

    return out[:, :batch].T                                      # (B, 2)


def policy_forward(x, w1_k, b1_k, dw_k, db_k):
    """Single CartPole state (4,) -> action probs (2,): matches torch Policy.forward.

    NOTE (per perf review): at B=1 the cost is pure launch overhead; in a real
    REINFORCE loop, batch rollout states and call policy_forward_batch instead.
    """
    return policy_forward_batch(x[None, :], w1_k, b1_k, dw_k, db_k)[0]


if __name__ == "__main__":
    key = jax.random.PRNGKey(0)
    pkey, xkey = jax.random.split(key)
    w1, b1, w2, b2 = init_params(pkey)
    params = prepare_params(w1, b1, w2, b2)

    # small batch of CartPole-like states (batch=8, state dim=4, hidden=32, actions=2)
    B = 8
    x = jax.random.normal(xkey, (B, IN_DIM), jnp.float32)

    probs = jax.block_until_ready(policy_forward_batch(x, *params))

    # pure-JAX reference: per-state relu(fc1) -> softmax over the 2 action logits
    h_ref = jnp.maximum(x @ w1.T + b1, 0.0)
    logits_ref = h_ref @ w2.T + b2
    probs_ref = jax.nn.softmax(logits_ref, axis=-1)

    assert probs.shape == (B, OUT_DIM)
    assert jnp.allclose(probs, probs_ref, atol=1e-5), float(jnp.max(jnp.abs(probs - probs_ref)))
    assert jnp.allclose(jnp.sum(probs, axis=-1), 1.0, atol=1e-6)

    # single-state path (exactly what the torch module sees in the REINFORCE loop)
    p_single = jax.block_until_ready(policy_forward(x[0], *params))
    assert p_single.shape == (OUT_DIM,)
    assert jnp.allclose(p_single, probs_ref[0], atol=1e-5)

    print("KERNEL_OK")
</pallas_src>

<mosaic_0001>
module attributes {stable_mosaic.version = 11 : i64} {
  func.func @policy_kernel(%arg0: i32, %arg1: memref<4x128xf32, #tpu.memory_space<vmem>>, %arg2: memref<32x4xf32, #tpu.memory_space<vmem>>, %arg3: memref<32x1xf32, #tpu.memory_space<vmem>>, %arg4: memref<32x1xf32, #tpu.memory_space<vmem>>, %arg5: memref<1x1xf32, #tpu.memory_space<smem>>, %arg6: memref<2x128xf32, #tpu.memory_space<vmem>>) attributes {dimension_semantics = [#tpu.dimension_semantics<parallel>], iteration_bounds = array<i64: 1>, scalar_prefetch = 0 : i64, scratch_operands = 0 : i64, tpu.core_type = #tpu.core_type<tc>, window_params = [{transform_indices = @transform_0, window_bounds = array<i64: 4, 128>}, {pipeline_mode = #tpu.pipeline_mode<synchronous>, transform_indices = @transform_1, window_bounds = array<i64: 32, 4>}, {pipeline_mode = #tpu.pipeline_mode<synchronous>, transform_indices = @transform_2, window_bounds = array<i64: 32, 1>}, {pipeline_mode = #tpu.pipeline_mode<synchronous>, transform_indices = @transform_3, window_bounds = array<i64: 32, 1>}, {transform_indices = @transform_4, window_bounds = array<i64: 1, 1>}, {transform_indices = @transform_5, window_bounds = array<i64: 2, 128>}]} {
    %c0 = arith.constant 0 : index
    %c0_0 = arith.constant 0 : index
    %0 = vector.load %arg1[%c0, %c0_0] : memref<4x128xf32, #tpu.memory_space<vmem>>, vector<4x128xf32>
    %c0_1 = arith.constant 0 : index
    %c0_2 = arith.constant 0 : index
    %1 = vector.load %arg2[%c0_1, %c0_2] : memref<32x4xf32, #tpu.memory_space<vmem>>, vector<32x4xf32>
    %2 = vector.extract_strided_slice %1 {offsets = [0, 0], sizes = [32, 1], strides = [1, 1]} : vector<32x4xf32> to vector<32x1xf32>
    %3 = vector.extract_strided_slice %0 {offsets = [0, 0], sizes = [1, 128], strides = [1, 1]} : vector<4x128xf32> to vector<1x128xf32>
    %4 = vector.broadcast %2 : vector<32x1xf32> to vector<32x128xf32>
    %5 = vector.broadcast %3 : vector<1x128xf32> to vector<32x128xf32>
    %6 = arith.mulf %4, %5 : vector<32x128xf32>
    %7 = vector.extract_strided_slice %1 {offsets = [0, 1], sizes = [32, 1], strides = [1, 1]} : vector<32x4xf32> to vector<32x1xf32>
    %8 = vector.extract_strided_slice %0 {offsets = [1, 0], sizes = [1, 128], strides = [1, 1]} : vector<4x128xf32> to vector<1x128xf32>
    %9 = vector.broadcast %7 : vector<32x1xf32> to vector<32x128xf32>
    %10 = vector.broadcast %8 : vector<1x128xf32> to vector<32x128xf32>
    %11 = arith.mulf %9, %10 : vector<32x128xf32>
    %12 = arith.addf %6, %11 : vector<32x128xf32>
    %13 = vector.extract_strided_slice %1 {offsets = [0, 2], sizes = [32, 1], strides = [1, 1]} : vector<32x4xf32> to vector<32x1xf32>
    %14 = vector.extract_strided_slice %0 {offsets = [2, 0], sizes = [1, 128], strides = [1, 1]} : vector<4x128xf32> to vector<1x128xf32>
    %15 = vector.broadcast %13 : vector<32x1xf32> to vector<32x128xf32>
    %16 = vector.broadcast %14 : vector<1x128xf32> to vector<32x128xf32>
    %17 = arith.mulf %15, %16 : vector<32x128xf32>
    %18 = arith.addf %12, %17 : vector<32x128xf32>
    %19 = vector.extract_strided_slice %1 {offsets = [0, 3], sizes = [32, 1], strides = [1, 1]} : vector<32x4xf32> to vector<32x1xf32>
    %20 = vector.extract_strided_slice %0 {offsets = [3, 0], sizes = [1, 128], strides = [1, 1]} : vector<4x128xf32> to vector<1x128xf32>
    %21 = vector.broadcast %19 : vector<32x1xf32> to vector<32x128xf32>
    %22 = vector.broadcast %20 : vector<1x128xf32> to vector<32x128xf32>
    %23 = arith.mulf %21, %22 : vector<32x128xf32>
    %24 = arith.addf %18, %23 : vector<32x128xf32>
    %c0_3 = arith.constant 0 : index
    %c0_4 = arith.constant 0 : index
    %25 = vector.load %arg3[%c0_3, %c0_4] : memref<32x1xf32, #tpu.memory_space<vmem>>, vector<32x1xf32>
    %26 = vector.broadcast %25 : vector<32x1xf32> to vector<32x128xf32>
    %27 = arith.addf %24, %26 : vector<32x128xf32>
    %cst = arith.constant 0.000000e+00 : f32
    %28 = vector.broadcast %cst : f32 to vector<32x128xf32>
    %29 = arith.maximumf %27, %28 : vector<32x128xf32>
    %c0_5 = arith.constant 0 : index
    %c0_6 = arith.constant 0 : index
    %30 = vector.load %arg4[%c0_5, %c0_6] : memref<32x1xf32, #tpu.memory_space<vmem>>, vector<32x1xf32>
    %31 = vector.broadcast %30 : vector<32x1xf32> to vector<32x128xf32>
    %32 = arith.mulf %31, %29 : vector<32x128xf32>
    %cst_7 = arith.constant dense<0.000000e+00> : vector<128xf32>
    %33 = vector.multi_reduction <add>, %32, %cst_7 [0] : vector<32x128xf32> to vector<128xf32>
    %34 = vector.shape_cast %33 : vector<128xf32> to vector<1x128xf32>
    %c0_8 = arith.constant 0 : index
    %c0_9 = arith.constant 0 : index
    %35 = memref.load %arg5[%c0_8, %c0_9] : memref<1x1xf32, #tpu.memory_space<smem>>
    %36 = vector.broadcast %35 : f32 to vector<1x128xf32>
    %37 = arith.addf %34, %36 : vector<1x128xf32>
    %cst_10 = arith.constant 0.000000e+00 : f32
    %38 = vector.broadcast %cst_10 : f32 to vector<1x128xf32>
    %39 = arith.subf %38, %37 : vector<1x128xf32>
    %40 = math.exp %39 : vector<1x128xf32>
    %cst_11 = arith.constant 1.000000e+00 : f32
    %41 = vector.broadcast %cst_11 : f32 to vector<1x128xf32>
    %42 = arith.addf %41, %40 : vector<1x128xf32>
    %cst_12 = arith.constant 1.000000e+00 : f32
    %43 = vector.broadcast %cst_12 : f32 to vector<1x128xf32>
    %44 = arith.divf %43, %42 : vector<1x128xf32>
    %c0_13 = arith.constant 0 : index
    %c0_14 = arith.constant 0 : index
    %45 = vector.load %arg6[%c0_13, %c0_14] : memref<2x128xf32, #tpu.memory_space<vmem>>, vector<1x128xf32>
    tpu.vector_store %arg6[%c0_13, %c0_14], %44 {strides = array<i32>} : memref<2x128xf32, #tpu.memory_space<vmem>>, vector<1x128xf32>,
    %cst_15 = arith.constant 1.000000e+00 : f32
    %46 = vector.broadcast %cst_15 : f32 to vector<1x128xf32>
    %47 = arith.subf %46, %44 : vector<1x128xf32>
    %c1 = arith.constant 1 : index
    %c0_16 = arith.constant 0 : index
    %48 = vector.load %arg6[%c1, %c0_16] : memref<2x128xf32, #tpu.memory_space<vmem>>, vector<1x128xf32>
    tpu.vector_store %arg6[%c1, %c0_16], %47 {strides = array<i32>} : memref<2x128xf32, #tpu.memory_space<vmem>>, vector<1x128xf32>,
    return
  }
  func.func @transform_0(%arg0: i32) -> (i32, i32) {
    %c0_i32 = arith.constant 0 : i32
    %c0_i32_0 = arith.constant 0 : i32
    return %c0_i32, %arg0 : i32, i32
  }
  func.func @transform_1(%arg0: i32) -> (i32, i32) {
    %c0_i32 = arith.constant 0 : i32
    %c0_i32_0 = arith.constant 0 : i32
    %c0_i32_1 = arith.constant 0 : i32
    return %c0_i32, %c0_i32_0 : i32, i32
  }
  func.func @transform_2(%arg0: i32) -> (i32, i32) {
    %c0_i32 = arith.constant 0 : i32
    %c0_i32_0 = arith.constant 0 : i32
    %c0_i32_1 = arith.constant 0 : i32
    return %c0_i32, %c0_i32_0 : i32, i32
  }
  func.func @transform_3(%arg0: i32) -> (i32, i32) {
    %c0_i32 = arith.constant 0 : i32
    %c0_i32_0 = arith.constant 0 : i32
    %c0_i32_1 = arith.constant 0 : i32
    return %c0_i32, %c0_i32_0 : i32, i32
  }
  func.func @transform_4(%arg0: i32) -> (i32, i32) {
    %c0_i32 = arith.constant 0 : i32
    %c0_i32_0 = arith.constant 0 : i32
    %c0_i32_1 = arith.constant 0 : i32
    return %c0_i32, %c0_i32_0 : i32, i32
  }
  func.func @transform_5(%arg0: i32) -> (i32, i32) {
    %c0_i32 = arith.constant 0 : i32
    %c0_i32_0 = arith.constant 0 : i32
    return %c0_i32, %arg0 : i32, i32
  }
}

</mosaic_0001>

<bundles_post_ra>
// kernel: policy_forward_batch.1
= control target key start
LH: loop header
LB: loop body
LE: loop exit
PB: predicated region body
PF: predicated region fallthrough
CT: control target
= control target key end

     0   :  { %v244_v0 = vmov 1   ;;  %v245_v1 = vmov 0   ;;  %v246_v6 = vmov 3   ;;  %v247_v7 = vmov 2   ;;  %s326_s1 = inlined_call_operand.vmem [shape: f32[32,4], index: 1, kind: input, shape index: {}]   ;;  %s327_s2 = inlined_call_operand.vmem [shape: f32[32,1], index: 2, kind: input, shape index: {}]   ;;  %s328_s3 = inlined_call_operand.vmem [shape: f32[32,1], index: 3, kind: input, shape index: {}]   ;;  %s329_s0 = inlined_call_operand.vmem [shape: f32[4,128], index: 0, kind: input, shape index: {}]   ;;  %s330_s4 = inlined_call_operand.<no memory space> [shape: f32[1,1], index: 4, kind: input, shape index: {}]   ;;  %s331_s5 = inlined_call_operand.vmem [shape: f32[2,128], index: 5, kind: output, shape index: {}]  }
   0x1   :  { %230 = vset.pattern.permute.xlu0 %v244_v0  ;;  %228 = vset.pattern.permute.xlu1 %v245_v1  ;;  %v24_v2 = vld [vmem:[%s326_s1 + $0x10] sm:$0xff]  ;;  %v22_v3 = vld [vmem:[%s326_s1] sm:$0xff]  ;;  %v25_v4 = vld [vmem:[%s326_s1 + $0x18] sm:$0xff] }
   0x2   :  { %229 = vset.pattern.permute.xlu2 %v244_v0  ;;  %60 = vperm.xlu0 %230, %v24_v2   ;;  %v23_v5 = vld [vmem:[%s326_s1 + $0x8] sm:$0xff]  ;;  %v126_v8 = vld [vmem:[%s327_s2] sm:$0xff]  ;;  %v128_v11 = vld [vmem:[%s327_s2 + $0x10] sm:$0xff] }
   0x3   :  { %38 = vperm.xlu1 %228, %v24_v2   ;;  %52 = vperm.xlu2 %229, %v22_v3   ;;  %v159_v9 = vld [vmem:[%s328_s3 + $0x8] sm:$0xff]  ;;  %v129_v12 = vld [vmem:[%s327_s2 + $0x18] sm:$0xff]  ;;  %v158_v13 = vld [vmem:[%s328_s3] sm:$0xff] }
   0x4   :  { %v127_v10 = vld [vmem:[%s327_s2 + $0x8] sm:$0xff]  ;;  %v160_v14 = vld [vmem:[%s328_s3 + $0x10] sm:$0xff]  ;;  %v161_v15 = vld [vmem:[%s328_s3 + $0x18] sm:$0xff] }
   0x5   :  { %v21_v29 = vld [vmem:[%s329_s0] sm:$0xf] }
   0x6   :  { %v46_v32 = vperm.slane %v21_v29, 0  ;;  %v67_v34 = vperm.slane %v21_v29, 1  ;;  %v92_v39 = vperm.slane %v21_v29, 2  ;;  %v117_v42 = vperm.slane %v21_v29, 3 }
   0x7   :  { %v196_v29 = vstv %s330_s4 }
   0xa   :  { %234 = vset.pattern.permute.xlu0 %v246_v6 }
   0xb   :  { %43 = vperm.xlu1 %228, %v25_v4   ;;  %102 = vperm.xlu0 %234, %v22_v3  }
   0xc   :  { %56 = vperm.xlu2 %229, %v23_v5  }
  0x13   :  { %231 = vset.pattern.permute.xlu1 %v247_v7  ;;  %235 = vset.pattern.permute.xlu0 %v245_v1 }
  0x14   :  { %77 = vperm.xlu1 %231, %v22_v3   ;;  %232 = vset.pattern.permute.xlu2 %v247_v7 }
  0x15   :  { %28 = vperm.xlu0 %235, %v22_v3   ;;  %81 = vperm.xlu2 %232, %v23_v5  }
  0x1c   :  { %233 = vset.pattern.permute.xlu1 %v244_v0 }
  0x1d   :  { %33 = vperm.xlu0 %235, %v23_v5   ;;  %64 = vperm.xlu1 %233, %v25_v4  }
  0x1e   :  { %85 = vperm.xlu2 %232, %v24_v2  }
  0x25   :  { %132 = vperm.xlu0 %235, %v126_v8   ;;  %236 = vset.pattern.permute.xlu1 %v246_v6 }
  0x26   :  { %106 = vperm.xlu1 %236, %v23_v5   ;;  %89 = vperm.xlu2 %232, %v25_v4  }
  0x2d   :  { %169 = vperm.xlu0 %235, %v159_v9  }
  0x2e   :  { %110 = vperm.xlu1 %236, %v24_v2   ;;  %237 = vset.pattern.permute.xlu2 %v246_v6 }
  0x2f   :  { %114 = vperm.xlu2 %237, %v25_v4  }
  0x36   :  { %238 = vset.pattern.permute.xlu1 %v245_v1 }
  0x37   :  { %137 = vperm.xlu1 %238, %v127_v10   ;;  %239 = vset.pattern.permute.xlu2 %v245_v1 }
  0x38   :  { %142 = vperm.xlu2 %239, %v128_v11  }
  0x3f   :  { %147 = vperm.xlu1 %238, %v129_v12  }
  0x40   :  { %164 = vperm.xlu2 %239, %v158_v13  }
  0x47   :  { %174 = vperm.xlu1 %238, %v160_v14  }
  0x48   :  { %179 = vperm.xlu2 %239, %v161_v15  }
  0x5d   :  { %v53_v16 = vpop.permute.xlu2 %52 }
  0x5e   :  { %v68_v37 = vmul.f32 %v67_v34, %v53_v16 }
  0x66   :  { %v57_v18 = vpop.permute.xlu2 %56 }
  0x67   :  { %v69_v38 = vmul.f32 %v67_v34, %v57_v18 }
  0x6f   :  { %v82_v20 = vpop.permute.xlu2 %81 }
  0x70   :  { %v94_v46 = vmul.f32 %v92_v39, %v82_v20 }
  0x74   :  { %v61_v21 = vpop.permute.xlu0 %60 }
  0x75   :  { %v39_v17 = vpop.permute.xlu1 %38  ;;  %v70_v40 = vmul.f32 %v67_v34, %v61_v21 }
  0x76   :  { %v49_v41 = vmul.f32 %v46_v32, %v39_v17 }
  0x78   :  { %v86_v24 = vpop.permute.xlu2 %85  ;;  %v74_v50 = vadd.f32 %v70_v40, %v49_v41 }
  0x79   :  { %v95_v51 = vmul.f32 %v92_v39, %v86_v24 }
  0x7b   :  { %v99_v62 = vadd.f32 %v95_v51, %v74_v50 }
  0x7d   :  { %v44_v19 = vpop.permute.xlu1 %43  ;;  %v103_v23 = vpop.permute.xlu0 %102 }
  0x7e   :  { %v50_v47 = vmul.f32 %v46_v32, %v44_v19  ;;  %v118_v54 = vmul.f32 %v117_v42, %v103_v23 }
  0x80   :  { %v90_v26 = vpop.permute.xlu2 %89 }
  0x81   :  { %v96_v59 = vmul.f32 %v92_v39, %v90_v26 }
  0x86   :  { %v78_v22 = vpop.permute.xlu1 %77 }
  0x87   :  { %v29_v27 = vpop.permute.xlu0 %28  ;;  %v93_v48 = vmul.f32 %v92_v39, %v78_v22 }
  0x88   :  { %v47_v35 = vmul.f32 %v46_v32, %v29_v27 }
  0x89   :  { %v115_v30 = vpop.permute.xlu2 %114 }
  0x8a   :  { %v72_v43 = vadd.f32 %v68_v37, %v47_v35  ;;  %v121_v63 = vmul.f32 %v117_v42, %v115_v30 }
  0x8c   :  { %v97_v56 = vadd.f32 %v93_v48, %v72_v43 }
  0x8e   :  { %v122_v0 = vadd.f32 %v118_v54, %v97_v56 }
  0x8f   :  { %v65_v25 = vpop.permute.xlu1 %64  ;;  %v34_v31 = vpop.permute.xlu0 %33 }
  0x90   :  { %v48_v36 = vmul.f32 %v46_v32, %v34_v31  ;;  %v71_v45 = vmul.f32 %v67_v34, %v65_v25 }
  0x92   :  { %v73_v44 = vadd.f32 %v69_v38, %v48_v36  ;;  %v143_v52 = vpop.permute.xlu2 %142  ;;  %v75_v55 = vadd.f32 %v71_v45, %v50_v47 }
  0x94   :  { %v98_v57 = vadd.f32 %v94_v46, %v73_v44  ;;  %v100_v2 = vadd.f32 %v96_v59, %v75_v55 }
  0x96   :  { %v125_v7 = vadd.f32 %v121_v63, %v100_v2 }
  0x97   :  { %v133_v58 = vpop.permute.xlu0 %132 }
  0x98   :  { %v107_v28 = vpop.permute.xlu1 %106  ;;  %v150_v3 = vadd.f32 %v133_v58, %v122_v0 }
  0x99   :  { %v119_v49 = vmul.f32 %v117_v42, %v107_v28 }
  0x9a   :  { %v165_v8 = vpop.permute.xlu2 %164  ;;  %v154_v9 = vmax.f32 %v150_v3, 0.0 }
  0x9b   :  { %v123_v61 = vadd.f32 %v119_v49, %v98_v57 }
  0x9c   :  { %v182_v14 = vmul.f32 %v165_v8, %v154_v9 }
  0x9f   :  { %v170_v12 = vpop.permute.xlu0 %169 }
  0xa0   :  { %v111_v33 = vpop.permute.xlu1 %110 }
  0xa1   :  { %v120_v60 = vmul.f32 %v117_v42, %v111_v33 }
  0xa2   :  { %v180_v20 = vpop.permute.xlu2 %179 }
  0xa3   :  { %v124_v4 = vadd.f32 %v120_v60, %v99_v62 }
  0xa5   :  { %v152_v11 = vadd.f32 %v143_v52, %v124_v4 }
  0xa7   :  { %v156_v16 = vmax.f32 %v152_v11, 0.0 }
  0xa9   :  { %v138_v53 = vpop.permute.xlu1 %137 }
  0xaa   :  { %v151_v1 = vadd.f32 %v138_v53, %v123_v61 }
  0xac   :  { %v155_v6 = vmax.f32 %v151_v1, 0.0 }
  0xae   :  { %v183_v13 = vmul.f32 %v170_v12, %v155_v6 }
  0xb0   :  { %v186_v19 = vadd.f32 %v183_v13, %v182_v14 }
  0xb1   :  { %v148_v5 = vpop.permute.xlu1 %147 }
  0xb2   :  { %v153_v10 = vadd.f32 %v148_v5, %v125_v7 }
  0xb4   :  { %v157_v15 = vmax.f32 %v153_v10, 0.0 }
  0xb6   :  { %v185_v21 = vmul.f32 %v180_v20, %v157_v15 }
  0xb9   :  { %v175_v17 = vpop.permute.xlu1 %174 }
  0xba   :  { %v184_v18 = vmul.f32 %v175_v17, %v156_v16 }
  0xbc   :  { %v187_v22 = vadd.f32 %v186_v19, %v184_v18 }
  0xbe   :  { %v188_v23 = vadd.f32 %v187_v22, %v185_v21 }
  0xc0   :  { %v189_v24 = vrot.slane %v188_v23, 4 }
  0xc2   :  { %v190_v25 = vadd.f32 %v189_v24, %v188_v23 }
  0xc4   :  { %v191_v26 = vrot.slane %v190_v25, 2 }
  0xc6   :  { %v192_v27 = vadd.f32 %v191_v26, %v190_v25 }
  0xc8   :  { %v193_v28 = vrot.slane %v192_v27, 1 }
  0xca   :  { %v194_v30 = vadd.f32 %v193_v28, %v192_v27 }
  0xcc   :  { %v197_v31 = vadd.f32 %v196_v29, %v194_v30 }
  0xce   :  { %v198_v32 = vsub.f32 0.0, %v197_v31 }
  0xd0   :  { %v199_v33 = vmul.f32 1.442695, %v198_v32 }
  0xd2   :  { %240 = vpow2.f32 %v199_v33 }
  0xd8   :  { %v241_v34 = vpop.eup %240 }
  0xd9   :  { %v201_v35 = vadd.f32 1.0, %v241_v34 }
  0xdb   :  { %242 = vrcp.f32 %v201_v35  ;;  %v213_v39 = vand.u32 2147483648, %v201_v35  ;;  %v211_v41 = vand.u32 2147483647, %v201_v35  ;;  %vm207_vm1 = vweird.f32 %v201_v35 }
  0xdd   :  { %v214_v43 = vor.u32 1.1754944e-38, %v213_v39  ;;  %vm212_vm3 = vcmp.eq.f32.partialorder %v211_v41, 8.507059e+37 }
  0xe1   :  { %v243_v36 = vpop.eup %242 }
  0xe2   :  { %v203_v37 = vmul.f32 %v243_v36, %v201_v35  ;;  %vm208_vm0 = vweird.f32 %v243_v36 }
  0xe3   :  { %vm209_vm2 = vmor %vm207_vm1, %vm208_vm0 }
  0xe4   :  { %v204_v38 = vsub.f32 1.0, %v203_v37 }
  0xe6   :  { %v205_v40 = vmul.f32 %v243_v36, %v204_v38 }
  0xe8   :  { %v206_v42 = vadd.f32 %v243_v36, %v205_v40 }
  0xea   :  { %v210_v44 = vsel %vm209_vm2, %v243_v36, %v206_v42 }
  0xeb   :  { %v215_v45 = vsel %vm212_vm3, %v214_v43, %v210_v44 }
  0xec   :  { %217 = vst [vmem:[%s331_s5] sm:$0x1] %v215_v45  ;;  %v218_v46 = vsub.f32 1.0, %v215_v45 }
  0xee   :  { %219 = vst [vmem:[%s331_s5 + $0x1] sm:$0x1] %v218_v46 }

</bundles_post_ra>
